<compile_context>
chip_gen: v7x
topology: tpu7x:2x2x1
jax: 0.10.0
libtpu: 0.0.40
codegen_flags: <defaults>
</compile_context>

<pallas_src>
import functools

import jax
import jax.numpy as jnp
from jax.experimental import pallas as pl
from jax.experimental.pallas import tpu as pltpu

_LANE = 128
_SUBLANE = 8


def _ce_kernel(w_ref, logits_ref, labels_ref, out_ref, *, num_classes):
    """Weighted CE over one (tile_s, 128)-pixel tile.

    w_ref      : (C,)                float32, SMEM  (per-class weights)
    logits_ref : (1, C, tile_s, 128) input dtype, VMEM
    labels_ref : (1, tile_s, 128)    int32, VMEM
    out_ref    : (1, 1, 8, 128)      float32 partial sums (lane-dense)
    """
    lbl = labels_ref[0]                                   # (tile_s, 128) int32

    # Running max over classes — unrolled, pure VPU (no cross-lane reductions).
    m = logits_ref[0, 0].astype(jnp.float32)
    for c in range(1, num_classes):
        m = jnp.maximum(m, logits_ref[0, c].astype(jnp.float32))

    # Single fused pass over classes: sum-exp + picked logit + picked weight.
    s = jnp.zeros_like(m)
    picked = jnp.zeros_like(m)
    wsel = jnp.zeros_like(m)
    for c in range(num_classes):
        xc = logits_ref[0, c].astype(jnp.float32)
        s = s + jnp.exp(xc - m)
        is_c = lbl == c
        picked = jnp.where(is_c, xc, picked)
        wsel = jnp.where(is_c, w_ref[c], wsel)            # scalar weight from SMEM

    # Per-pixel weighted CE. Padded pixels carry label == num_classes, so
    # wsel == 0 and picked == 0 -> exactly zero contribution.
    loss = wsel * ((m + jnp.log(s)) - picked)             # (tile_s, 128) f32

    # Reduce only over the vreg-granular axis (tile-aligned, free reshape);
    # the final cross-lane/sublane reduction happens once, in XLA.
    ts = loss.shape[0]
    out_ref[0, 0] = loss.reshape(ts // _SUBLANE, _SUBLANE, _LANE).sum(axis=0)


def ce_loss_pallas(outputs_nchw, labels_bhw, class_weight,
                   *, vmem_buffer_budget_bytes=6 * 1024 * 1024):
    """outputs_nchw: (B, C, H, W) float; labels_bhw: (B, H, W) int; class_weight: (C,) float."""
    B, C, H, W = outputs_nchw.shape
    HW = H * W
    N = B * HW

    # --- tile sizing: biggest pixel tile that keeps double-buffered inputs under budget ---
    itemsize = jnp.dtype(outputs_nchw.dtype).itemsize
    per_row = 2 * _LANE * (C * itemsize + 4)              # 2 bufs x (logits + labels) per tile_s row
    cap = (vmem_buffer_budget_bytes // per_row) // _SUBLANE * _SUBLANE
    tile_s_max = max(_SUBLANE, min(1024, cap))

    s0 = pl.cdiv(HW, _LANE)                               # spatial rows of 128 pixels
    n_tiles = pl.cdiv(s0, tile_s_max)
    tile_s = pl.cdiv(pl.cdiv(s0, n_tiles), _SUBLANE) * _SUBLANE
    S = n_tiles * tile_s
    pad = S * _LANE - HW

    # --- glue: free reshapes only; pad (with sentinel label) only when needed ---
    logits = outputs_nchw.reshape(B, C, HW)               # NO transpose
    labels = labels_bhw.reshape(B, HW).astype(jnp.int32)
    if pad:
        logits = jnp.pad(logits, ((0, 0), (0, 0), (0, pad)))
        labels = jnp.pad(labels, ((0, 0), (0, pad)), constant_values=C)
    logits = logits.reshape(B, C, S, _LANE)
    labels = labels.reshape(B, S, _LANE)
    weight = class_weight.reshape(C).astype(jnp.float32)

    kernel = functools.partial(_ce_kernel, num_classes=C)

    partials = pl.pallas_call(
        kernel,
        out_shape=jax.ShapeDtypeStruct((B, n_tiles, _SUBLANE, _LANE), jnp.float32),
        grid_spec=pltpu.PrefetchScalarGridSpec(
            num_scalar_prefetch=0,
            grid=(B, n_tiles),
            in_specs=[
                pl.BlockSpec(memory_space=pltpu.MemorySpace.SMEM),               # class weights
                pl.BlockSpec((1, C, tile_s, _LANE), lambda b, t: (b, 0, t, 0)),  # logits tile
                pl.BlockSpec((1, tile_s, _LANE), lambda b, t: (b, t, 0)),        # labels tile
            ],
            out_specs=pl.BlockSpec((1, 1, _SUBLANE, _LANE), lambda b, t: (b, t, 0, 0)),
        ),
        compiler_params=pltpu.CompilerParams(
            dimension_semantics=("parallel", "parallel"),   # no carried state -> megacore-splittable
            vmem_limit_bytes=32 * 1024 * 1024,              # explicit, safe on v5e/v6e/v7x
        ),
    )(weight, logits, labels)

    total = jnp.sum(partials) / jnp.float32(N)
    return {"total_loss": total}


def ce_loss_ref(outputs_nchw, labels_bhw, class_weight):
    """Pure-JAX reference mirroring F.cross_entropy(reduction='none', weight=w) + torch.mean."""
    B, C, H, W = outputs_nchw.shape
    logits = jnp.transpose(outputs_nchw, (0, 2, 3, 1)).reshape(-1, C).astype(jnp.float32)
    labels = labels_bhw.reshape(-1)
    lse = jax.nn.logsumexp(logits, axis=1)
    picked = jnp.take_along_axis(logits, labels[:, None], axis=1)[:, 0]
    w = class_weight.astype(jnp.float32)[labels]
    return jnp.mean(w * (lse - picked))


if __name__ == "__main__":
    key = jax.random.PRNGKey(0)
    k1, k2 = jax.random.split(key)

    B, C, H, W = 2, 4, 16, 16
    outputs = jax.random.normal(k1, (B, C, H, W), dtype=jnp.float32)
    labels = jax.random.randint(k2, (B, H, W), 0, C, dtype=jnp.int32)

    # deterministic config['ce_weight'] (per-class weights)
    ce_weight = jnp.array([1.0, 2.0, 0.5, 1.5], dtype=jnp.float32)

    result = ce_loss_pallas(outputs, labels, ce_weight)
    loss = jax.block_until_ready(result["total_loss"])

    ref = ce_loss_ref(outputs, labels, ce_weight)
    assert jnp.allclose(loss, ref, rtol=1e-5, atol=1e-5), (loss, ref)

    print("KERNEL_OK")
</pallas_src>

<mosaic_0001>
module attributes {stable_mosaic.version = 11 : i64} {
  func.func @_ce_kernel(%arg0: i32, %arg1: i32, %arg2: memref<4xf32, #tpu.memory_space<smem>>, %arg3: memref<1x4x8x128xf32, #tpu.memory_space<vmem>>, %arg4: memref<1x8x128xi32, #tpu.memory_space<vmem>>, %arg5: memref<1x1x8x128xf32, #tpu.memory_space<vmem>>) attributes {dimension_semantics = [#tpu.dimension_semantics<parallel>, #tpu.dimension_semantics<parallel>], iteration_bounds = array<i64: 2, 1>, scalar_prefetch = 0 : i64, scratch_operands = 0 : i64, tpu.core_type = #tpu.core_type<tc>, window_params = [{transform_indices = @transform_0, window_bounds = array<i64: 4>}, {transform_indices = @transform_1, window_bounds = array<i64: 1, 4, 8, 128>}, {transform_indices = @transform_2, window_bounds = array<i64: 1, 8, 128>}, {transform_indices = @transform_3, window_bounds = array<i64: 1, 1, 8, 128>}]} {
    %c0 = arith.constant 0 : index
    %c0_0 = arith.constant 0 : index
    %c0_1 = arith.constant 0 : index
    %0 = vector.load %arg4[%c0, %c0_0, %c0_1] : memref<1x8x128xi32, #tpu.memory_space<vmem>>, vector<1x8x128xi32>
    %1 = vector.shape_cast %0 : vector<1x8x128xi32> to vector<8x128xi32>
    %c0_2 = arith.constant 0 : index
    %c0_3 = arith.constant 0 : index
    %c0_4 = arith.constant 0 : index
    %c0_5 = arith.constant 0 : index
    %2 = vector.load %arg3[%c0_2, %c0_3, %c0_4, %c0_5] : memref<1x4x8x128xf32, #tpu.memory_space<vmem>>, vector<1x1x8x128xf32>
    %3 = vector.shape_cast %2 : vector<1x1x8x128xf32> to vector<8x128xf32>
    %c0_6 = arith.constant 0 : index
    %c1 = arith.constant 1 : index
    %c0_7 = arith.constant 0 : index
    %c0_8 = arith.constant 0 : index
    %4 = vector.load %arg3[%c0_6, %c1, %c0_7, %c0_8] : memref<1x4x8x128xf32, #tpu.memory_space<vmem>>, vector<1x1x8x128xf32>
    %5 = vector.shape_cast %4 : vector<1x1x8x128xf32> to vector<8x128xf32>
    %6 = arith.maximumf %3, %5 : vector<8x128xf32>
    %c0_9 = arith.constant 0 : index
    %c2 = arith.constant 2 : index
    %c0_10 = arith.constant 0 : index
    %c0_11 = arith.constant 0 : index
    %7 = vector.load %arg3[%c0_9, %c2, %c0_10, %c0_11] : memref<1x4x8x128xf32, #tpu.memory_space<vmem>>, vector<1x1x8x128xf32>
    %8 = vector.shape_cast %7 : vector<1x1x8x128xf32> to vector<8x128xf32>
    %9 = arith.maximumf %6, %8 : vector<8x128xf32>
    %c0_12 = arith.constant 0 : index
    %c3 = arith.constant 3 : index
    %c0_13 = arith.constant 0 : index
    %c0_14 = arith.constant 0 : index
    %10 = vector.load %arg3[%c0_12, %c3, %c0_13, %c0_14] : memref<1x4x8x128xf32, #tpu.memory_space<vmem>>, vector<1x1x8x128xf32>
    %11 = vector.shape_cast %10 : vector<1x1x8x128xf32> to vector<8x128xf32>
    %12 = arith.maximumf %9, %11 : vector<8x128xf32>
    %cst = arith.constant 0.000000e+00 : f32
    %13 = vector.broadcast %cst : f32 to vector<8x128xf32>
    %cst_15 = arith.constant 0.000000e+00 : f32
    %14 = vector.broadcast %cst_15 : f32 to vector<8x128xf32>
    %cst_16 = arith.constant 0.000000e+00 : f32
    %15 = vector.broadcast %cst_16 : f32 to vector<8x128xf32>
    %c0_17 = arith.constant 0 : index
    %c0_18 = arith.constant 0 : index
    %c0_19 = arith.constant 0 : index
    %c0_20 = arith.constant 0 : index
    %16 = vector.load %arg3[%c0_17, %c0_18, %c0_19, %c0_20] : memref<1x4x8x128xf32, #tpu.memory_space<vmem>>, vector<1x1x8x128xf32>
    %17 = vector.shape_cast %16 : vector<1x1x8x128xf32> to vector<8x128xf32>
    %18 = arith.subf %17, %12 : vector<8x128xf32>
    %19 = math.exp %18 : vector<8x128xf32>
    %20 = arith.addf %13, %19 : vector<8x128xf32>
    %c0_i32 = arith.constant 0 : i32
    %21 = vector.broadcast %c0_i32 : i32 to vector<8x128xi32>
    %22 = arith.cmpi eq, %1, %21 : vector<8x128xi32>
    %23 = arith.select %22, %17, %14 : vector<8x128xi1>, vector<8x128xf32>
    %c0_21 = arith.constant 0 : index
    %24 = memref.load %arg2[%c0_21] : memref<4xf32, #tpu.memory_space<smem>>
    %25 = vector.broadcast %24 : f32 to vector<8x128xf32>
    %26 = arith.select %22, %25, %15 : vector<8x128xi1>, vector<8x128xf32>
    %c0_22 = arith.constant 0 : index
    %c1_23 = arith.constant 1 : index
    %c0_24 = arith.constant 0 : index
    %c0_25 = arith.constant 0 : index
    %27 = vector.load %arg3[%c0_22, %c1_23, %c0_24, %c0_25] : memref<1x4x8x128xf32, #tpu.memory_space<vmem>>, vector<1x1x8x128xf32>
    %28 = vector.shape_cast %27 : vector<1x1x8x128xf32> to vector<8x128xf32>
    %29 = arith.subf %28, %12 : vector<8x128xf32>
    %30 = math.exp %29 : vector<8x128xf32>
    %31 = arith.addf %20, %30 : vector<8x128xf32>
    %c1_i32 = arith.constant 1 : i32
    %32 = vector.broadcast %c1_i32 : i32 to vector<8x128xi32>
    %33 = arith.cmpi eq, %1, %32 : vector<8x128xi32>
    %34 = arith.select %33, %28, %23 : vector<8x128xi1>, vector<8x128xf32>
    %c1_26 = arith.constant 1 : index
    %35 = memref.load %arg2[%c1_26] : memref<4xf32, #tpu.memory_space<smem>>
    %36 = vector.broadcast %35 : f32 to vector<8x128xf32>
    %37 = arith.select %33, %36, %26 : vector<8x128xi1>, vector<8x128xf32>
    %c0_27 = arith.constant 0 : index
    %c2_28 = arith.constant 2 : index
    %c0_29 = arith.constant 0 : index
    %c0_30 = arith.constant 0 : index
    %38 = vector.load %arg3[%c0_27, %c2_28, %c0_29, %c0_30] : memref<1x4x8x128xf32, #tpu.memory_space<vmem>>, vector<1x1x8x128xf32>
    %39 = vector.shape_cast %38 : vector<1x1x8x128xf32> to vector<8x128xf32>
    %40 = arith.subf %39, %12 : vector<8x128xf32>
    %41 = math.exp %40 : vector<8x128xf32>
    %42 = arith.addf %31, %41 : vector<8x128xf32>
    %c2_i32 = arith.constant 2 : i32
    %43 = vector.broadcast %c2_i32 : i32 to vector<8x128xi32>
    %44 = arith.cmpi eq, %1, %43 : vector<8x128xi32>
    %45 = arith.select %44, %39, %34 : vector<8x128xi1>, vector<8x128xf32>
    %c2_31 = arith.constant 2 : index
    %46 = memref.load %arg2[%c2_31] : memref<4xf32, #tpu.memory_space<smem>>
    %47 = vector.broadcast %46 : f32 to vector<8x128xf32>
    %48 = arith.select %44, %47, %37 : vector<8x128xi1>, vector<8x128xf32>
    %c0_32 = arith.constant 0 : index
    %c3_33 = arith.constant 3 : index
    %c0_34 = arith.constant 0 : index
    %c0_35 = arith.constant 0 : index
    %49 = vector.load %arg3[%c0_32, %c3_33, %c0_34, %c0_35] : memref<1x4x8x128xf32, #tpu.memory_space<vmem>>, vector<1x1x8x128xf32>
    %50 = vector.shape_cast %49 : vector<1x1x8x128xf32> to vector<8x128xf32>
    %51 = arith.subf %50, %12 : vector<8x128xf32>
    %52 = math.exp %51 : vector<8x128xf32>
    %53 = arith.addf %42, %52 : vector<8x128xf32>
    %c3_i32 = arith.constant 3 : i32
    %54 = vector.broadcast %c3_i32 : i32 to vector<8x128xi32>
    %55 = arith.cmpi eq, %1, %54 : vector<8x128xi32>
    %56 = arith.select %55, %50, %45 : vector<8x128xi1>, vector<8x128xf32>
    %c3_36 = arith.constant 3 : index
    %57 = memref.load %arg2[%c3_36] : memref<4xf32, #tpu.memory_space<smem>>
    %58 = vector.broadcast %57 : f32 to vector<8x128xf32>
    %59 = arith.select %55, %58, %48 : vector<8x128xi1>, vector<8x128xf32>
    %60 = math.log %53 : vector<8x128xf32>
    %61 = arith.addf %12, %60 : vector<8x128xf32>
    %62 = arith.subf %61, %56 : vector<8x128xf32>
    %63 = arith.mulf %59, %62 : vector<8x128xf32>
    %64 = vector.shape_cast %63 : vector<8x128xf32> to vector<1x8x128xf32>
    %cst_37 = arith.constant dense<0.000000e+00> : vector<8x128xf32>
    %65 = vector.multi_reduction <add>, %64, %cst_37 [0] : vector<1x8x128xf32> to vector<8x128xf32>
    %c0_38 = arith.constant 0 : index
    %c0_39 = arith.constant 0 : index
    %c0_40 = arith.constant 0 : index
    %c0_41 = arith.constant 0 : index
    %66 = vector.load %arg5[%c0_38, %c0_39, %c0_40, %c0_41] : memref<1x1x8x128xf32, #tpu.memory_space<vmem>>, vector<1x1x8x128xf32>
    %67 = vector.shape_cast %66 : vector<1x1x8x128xf32> to vector<8x128xf32>
    %68 = vector.shape_cast %65 : vector<8x128xf32> to vector<1x1x8x128xf32>
    tpu.vector_store %arg5[%c0_38, %c0_39, %c0_40, %c0_41], %68 {strides = array<i32>} : memref<1x1x8x128xf32, #tpu.memory_space<vmem>>, vector<1x1x8x128xf32>,
    return
  }
  func.func @transform_0(%arg0: i32, %arg1: i32) -> i32 {
    %c0_i32 = arith.constant 0 : i32
    %c0_i32_0 = arith.constant 0 : i32
    return %c0_i32 : i32
  }
  func.func @transform_1(%arg0: i32, %arg1: i32) -> (i32, i32, i32, i32) {
    %c0_i32 = arith.constant 0 : i32
    %c0_i32_0 = arith.constant 0 : i32
    %c0_i32_1 = arith.constant 0 : i32
    return %arg0, %c0_i32, %arg1, %c0_i32_0 : i32, i32, i32, i32
  }
  func.func @transform_2(%arg0: i32, %arg1: i32) -> (i32, i32, i32) {
    %c0_i32 = arith.constant 0 : i32
    %c0_i32_0 = arith.constant 0 : i32
    return %arg0, %arg1, %c0_i32 : i32, i32, i32
  }
  func.func @transform_3(%arg0: i32, %arg1: i32) -> (i32, i32, i32, i32) {
    %c0_i32 = arith.constant 0 : i32
    %c0_i32_0 = arith.constant 0 : i32
    %c0_i32_1 = arith.constant 0 : i32
    return %arg0, %arg1, %c0_i32, %c0_i32_0 : i32, i32, i32, i32
  }
}

</mosaic_0001>

<bundles_post_ra>
// kernel: tpu_custom_call.1
= control target key start
LH: loop header
LB: loop body
LE: loop exit
PB: predicated region body
PF: predicated region fallthrough
CT: control target
= control target key end

     0   :  { %s990_s0 = inlined_call_operand.hbm [shape: f32[4], index: 0, kind: input, shape index: {}]   ;;  %s991_s1 = inlined_call_operand.hbm [shape: f32[2,4,8,128], index: 1, kind: input, shape index: {}]   ;;  %s992_s2 = inlined_call_operand.hbm [shape: s32[2,8,128], index: 2, kind: input, shape index: {}]   ;;  %s993_s3 = inlined_call_operand.hbm [shape: f32[2,1,8,128], index: 3, kind: output, shape index: {}]  }
   0x1   :  { %999 = sst [smem:[#allocation14_spill]] %s990_s0 }
   0x2   :  { %1000 = sst [smem:[#allocation15_spill]] %s991_s1 }
   0x3   :  { %8 = vsyncpa [#allocation5], 0 }
   0x4   :  { %9 = vsyncpa [#allocation3], 0 }
   0x5   :  { %11 = vsyncpa [#allocation3 + $0x1], 0 }
   0x6   :  { %12 = vsyncpa [#allocation8], 0 }
   0x7   :  { %14 = vsyncpa [#allocation8 + $0x1], 0 }
   0x8   :  { %15 = vsyncpa [#allocation4], 0 }
   0x9   :  { %17 = vsyncpa [#allocation4 + $0x1], 0  ;;  %s751_s12 = smov 0   ;;  %s753_s13 = smov 0  }
   0xa   :  { %s755_s14 = smov 0   ;;  %s757_s15 = smov 0  }
   0xb   :  { %s759_s16 = smov 0   ;;  %s761_s17 = smov 0  }
   0xc LB: > { %s444_s18 = sadd.s32 4294967295, %s723_s17   ;;  %s445_s19 = sadd.s32 4294967294, %s723_s17   ;;  %s723_s17 = sphi %s761_s17, %s23_s17   ;;  %s719_s16 = sphi %s759_s16, %s1019_s16   ;;  %s715_s15 = sphi %s757_s15, %s1018_s15   ;;  %s711_s14 = sphi %s755_s14, %s1017_s14   ;;  %s707_s13 = sphi %s753_s13, %s1016_s13   ;;  %s703_s12 = sphi %s751_s12, %s1015_s12  }
   0xd   : > { %s65_s20 = sadd.s32 1, %s711_s14  ;;  %p72_p0 = scmp.ne.s32.totalorder %s711_s14, %s707_s13 }
   0xe   : > { %p73_p1 = scmp.eq.s32.totalorder %s723_s17, 0  ;;  %p78_p2 = scmp.ne.s32.totalorder %s707_s13, %s703_s12 }
   0xf   : > { %p789_p3 = scmp.eq.s32.totalorder %s444_s18, 0  ;;  %p132_p4 = scmp.eq.s32.totalorder %s444_s18, 1 }
  0x10   : > { %p74_p5 = por %p73_p1, %p72_p0  ;;  %p138_p6 = scmp.eq.s32.totalorder %s445_s19, 1 }
  0x11   : > { %s1001_s21 = scalar_select %p789_p3, 1, 0 }
  0x12   : > { %p795_p7 = por %p789_p3, %p78_p2  ;;  %p799_p8 = por %p132_p4, %p72_p0 }
  0x13   : > { %p803_p9 = por %p138_p6, %p78_p2  ;;  %p446_p10 = scmp.ge.s32.totalorder %s723_s17, 1 }
  0x14   : > { %s1002_s22 = scalar_select %p795_p7, 1, 0 }
  0x15   : > { %s1003_s23 = scalar_select %p799_p8, 1, 0 }
  0x16   : > { %s1004_s24 = scalar_select %p803_p9, 1, 0 }
  0x17   : > { %p145_p11 = scmp.lt.s32.totalorder %s723_s17, 3  ;;  %p496_p1 = scmp.lt.s32.totalorder %s723_s17, 2 }
  0x18   : > { %s816_s26 = sand.u32 1, %s711_s14   ;;  %s35_s28 = sadd.s32 1, %s719_s16 }
  0x19   : > { %p810_p13 = pnand %p446_p10, %p145_p11  ;;  %p820_p4 = pnand %p496_p1, %p74_p5 }
  0x1a   : > { %s449_s29 = sshll.u32 %s816_s26, 5  ;;  %p37_p6 = scmp.ge.s32.totalorder %s35_s28, 2 }
  0x1b   : > { %s1005_s25 = scalar_select %p810_p13, 1, 0 }
  0x1c   : > { %p480_p0 = pneg %p810_p13  ;;  %s1007_s0 = sld [smem:[#allocation14_spill]] }
  0x1e   : > { %p481_p2 = pnand %p480_p0, %p789_p3 }
  0x20   : > { %p562_p11 = pneg %p481_p2 }
  0x22   : > { %s560_s5 = scalar_lea.hbm %s1007_s0, 16 }
  0x23   : > { %p561_p10 = scmp.ne.s32.totalorder %s1007_s0, %s560_s5  ;;  %p567_p5 = scmp.lt.u32.totalorder %s560_s5, %s1007_s0 }
  0x25   : > { %p563_p12 = pnand %p562_p11, %p561_p10 }
  0x27   : > { %p564_p9 = pneg %p563_p12 }
  0x29   : > { %p569_p1 = pnand %p567_p5, %p564_p9 }
  0x2b   : > { %572 = shalt.err (!%p569_p1)
}
  0x2c   : > { %s725_s10 = smov [#allocation2]   ;;  %s1021_s28 = smov (%p37_p6, %s35_s28), 0 }
  0x2d   : > { %483 = dma.hbm_to_smem (!%p481_p2), %s1007_s0, 16, %s725_s10, [#allocation5]  }
  0x2e   : > { %s469_s19 = sshll.u32 %s719_s16, 9  ;;  %s60_s30 = ssub.s32 %s719_s16, %s1021_s28 }
  0x2f   : > { %s1008_s1 = sld [smem:[#allocation15_spill]]  ;;  %p63_p9 = scmp.eq.s32.totalorder %s60_s30, 0 }
  0x30   : > { %s171_s7 = scalar_lea.vmem [#allocation6], %s449_s29  ;;  %s168_s10 = scalar_lea.sflag [#allocation3], %s816_s26 }
  0x31   : > { %s179_s8 = sshll.u32 %s171_s7, 4  ;;  %p575_p0 = pneg %p820_p4  ;;  %s850_s8 = int_to_ptr.vmem [resolvable:$true] %s179_s8 }
  0x32   : > { %s855_s9 = scalar_select %p63_p9, %s711_s14, %s65_s20  }
  0x35   : > { %s848_s6 = scalar_lea.hbm %s1008_s1, %s469_s19  ;;  %s578_s30 = scalar_lea.hbm %s1008_s1, 1024 }
  0x36   : > { %s573_s11 = scalar_lea.hbm %s848_s6, 512  ;;  %p579_p10 = scmp.lt.u32.totalorder %s848_s6, %s1008_s1 }
  0x37   : > { %p574_p12 = scmp.ne.s32.totalorder %s848_s6, %s573_s11  ;;  %p580_p11 = scmp.lt.u32.totalorder %s578_s30, %s573_s11 }
  0x38   : > { %p582_p1 = scmp.lt.u32.totalorder %s573_s11, %s848_s6 }
  0x39   : > { %p576_p2 = pnand %p575_p0, %p574_p12  ;;  %p581_p5 = por %p580_p11, %p579_p10 }
  0x3b   : > { %p577_p6 = pneg %p576_p2  ;;  %p583_p9 = por %p582_p1, %p581_p5 }
  0x3d   : > { %p584_p8 = pnand %p583_p9, %p577_p6 }
  0x3f   : > { %587 = shalt.err (!%p584_p8)
}
  0x40   : > { %s588_s20 = scalar_lea.vmem %s850_s8, 512  ;;  %s726_s5 = smov [#allocation6]  }
  0x41   : > { %p589_p12 = scmp.ne.s32.totalorder %s850_s8, %s588_s20  ;;  %s593_s7 = sshll.u32 %s726_s5, 4  ;;  %s594_s7 = int_to_ptr.vmem [resolvable:$false] %s593_s7 }
  0x42   : > { %s595_s18 = scalar_lea.vmem %s594_s7, 1024  ;;  %p596_p3 = scmp.lt.s32.totalorder %s850_s8, %s594_s7 }
  0x43   : > { %p591_p2 = pnand %p589_p12, %p575_p0  ;;  %p597_p10 = scmp.lt.s32.totalorder %s595_s18, %s588_s20 }
  0x45   : > { %p592_p7 = pneg %p591_p2  ;;  %p598_p11 = por %p597_p10, %p596_p3 }
  0x47   : > { %p599_p5 = pnand %p598_p11, %p592_p7 }
  0x49   : > { %602 = shalt.err (!%p599_p5)
}
  0x4a   : > { %s727_s11 = smov 128   ;;  %s728_s19 = smov 8  }
  0x4b   : > { %487 = dma.hbm_to_vmem [thread:$0]  (!%p820_p4), %s848_s6, 512, %s850_s8, %s168_s10, %s727_s11, %s727_s11, %s728_s19  }
  0x4c   : > { %s452_s30 = sshll.u32 %s816_s26, 3  ;;  %s453_s29 = sshll.u32 %s719_s16, 7 }
  0x4d   : > { %s890_s5 = scalar_lea.hbm %s992_s2, %s453_s29  ;;  %s193_s7 = scalar_lea.vmem [#allocation7], %s452_s30 }
  0x4e   : > { %s201_s18 = sshll.u32 %s193_s7, 4  ;;  %s190_s0 = scalar_lea.sflag [#allocation8], %s816_s26  ;;  %s202_s18 = int_to_ptr.vmem [resolvable:$true] %s201_s18 }
  0x4f   : > { %s603_s1 = scalar_lea.hbm %s890_s5, 128  ;;  %s608_s10 = scalar_lea.hbm %s992_s2, 256 }
  0x50   : > { %p604_p3 = scmp.ne.s32.totalorder %s890_s5, %s603_s1  ;;  %p609_p6 = scmp.lt.u32.totalorder %s890_s5, %s992_s2 }
  0x51   : > { %p610_p1 = scmp.lt.u32.totalorder %s608_s10, %s603_s1  ;;  %p612_p12 = scmp.lt.u32.totalorder %s603_s1, %s890_s5 }
  0x52   : > { %p606_p7 = pnand %p604_p3, %p575_p0 }
  0x53   : > { %p611_p9 = por %p610_p1, %p609_p6 }
  0x54   : > { %p607_p8 = pneg %p606_p7 }
  0x55   : > { %p613_p2 = por %p612_p12, %p611_p9 }
  0x57   : > { %p614_p10 = pnand %p613_p2, %p607_p8 }
  0x59   : > { %617 = shalt.err (!%p614_p10)
}
  0x5a   : > { %s618_s26 = scalar_lea.vmem %s202_s18, 128  ;;  %s729_s30 = smov [#allocation7]  }
  0x5b   : > { %p619_p11 = scmp.ne.s32.totalorder %s202_s18, %s618_s26  ;;  %s623_s29 = sshll.u32 %s729_s30, 4  ;;  %s624_s29 = int_to_ptr.vmem [resolvable:$false] %s623_s29 }
  0x5c   : > { %s625_s4 = scalar_lea.vmem %s624_s29, 256  ;;  %p626_p7 = scmp.lt.s32.totalorder %s202_s18, %s624_s29 }
  0x5d   : > { %p621_p5 = pnand %p619_p11, %p575_p0  ;;  %p627_p13 = scmp.lt.s32.totalorder %s625_s4, %s618_s26 }
  0x5f   : > { %p622_p3 = pneg %p621_p5  ;;  %p628_p1 = por %p627_p13, %p626_p7 }
  0x61   : > { %p629_p6 = pnand %p628_p1, %p622_p3 }
  0x63   : > { %632 = shalt.err (!%p629_p6)
}
  0x64   : > { %490 = dma.hbm_to_vmem [thread:$0]  (!%p820_p4), %s890_s5, 128, %s202_s18, %s190_s0  }
  0x65   : > { %p1009_p8 = scmp.ne.s32.totalorder %s1005_s25, 0 }
  0x66   : > { %p1010_p9 = scmp.ne.s32.totalorder (!%p1009_p8), %s1001_s21, 0 }
  0x67   : > { %210 = sbr.rel (%p1009_p8) target bundleno = 182 (0xb6), region = 32 }
  0x6e   : > { %686 = dma.done.wait (%p1010_p9), [#allocation5], 16  }
  0x6f   : > { %688 = vsyncadd (%p1010_p9), [#allocation5], 4294967280  ;;  %s919_s1 = sand.u32 1, %s707_s13   ;;  %p1011_p13 = scmp.ne.s32.totalorder %s1002_s22, 0 }
  0x70   : > { %s456_s20 = sshll.u32 %s919_s1, 5  ;;  %s217_s7 = scalar_lea.sflag [#allocation3], %s919_s1 }
  0x71   : > { %s220_s27 = scalar_lea.vmem [#allocation6], %s456_s20 }
  0x72   : > { %690 = dma.done.wait (%p1011_p13), %s217_s7, 512  }
  0x73   : > { %692 = vsyncadd (%p1011_p13), %s217_s7, 4294966784  ;;  %s457_s0 = sshll.u32 %s919_s1, 3  ;;  %s226_s21 = scalar_lea.sflag [#allocation8], %s919_s1 }
  0x74   : > { %s229_s25 = scalar_lea.vmem [#allocation7], %s457_s0 }
  0x75   : > { %694 = dma.done.wait (%p1011_p13), %s226_s21, 128  }
  0x76   : > { %696 = vsyncadd (%p1011_p13), %s226_s21, 4294967168 }
  0x77   : > { %234 = sfence }
  0x78   : > { %v259_v0 = vld [vmem:[%s220_s27] sm:$0xff]  ;;  %v459_v1 = vld [vmem:[%s220_s27 + $0x8] sm:$0xff]  ;;  %v460_v3 = vld [vmem:[%s220_s27 + $0x10] sm:$0xff]  ;;  %s275_s22 = sld [smem:[#allocation2]]  ;;  %s462_s5 = sld [smem:[#allocation2 + $0x1]] }
  0x79   : > { %v262_v2 = vmax.f32 %v259_v0, %v459_v1  ;;  %v461_v4 = vld [vmem:[%s220_s27 + $0x18] sm:$0xff]  ;;  %v258_v21 = vld [vmem:[%s229_s25] sm:$0xff]  ;;  %s463_s18 = sld [smem:[#allocation2 + $0x2]]  ;;  %s464_s6 = sld [smem:[#allocation2 + $0x3]] }
  0x7a   : > { %vm273_vm0 = vcmp.eq.s32.totalorder %v258_v21, 0  ;;  %vm282_vm1 = vcmp.eq.s32.totalorder %v258_v21, 1  ;;  %vm291_vm2 = vcmp.eq.s32.totalorder %v258_v21, 2  ;;  %vm300_vm3 = vcmp.eq.s32.totalorder %v258_v21, 3  ;;  %s257_s8 = scalar_lea.vmem [#allocation9], %s457_s0  ;;  %s466_s11 = sshll.u32 %s715_s15, 7 }
  0x7b   : > { %v265_v5 = vmax.f32 %v262_v2, %v460_v3  ;;  %v274_v24 = vsel %vm273_vm0, %v259_v0, 0.0  ;;  %s327_s10 = sshll.u32 %s257_s8, 4  ;;  %s943_s30 = scalar_lea.hbm %s993_s3, %s466_s11  ;;  %s938_s10 = int_to_ptr.vmem [resolvable:$true] %s327_s10 }
  0x7c   : > { %v283_v27 = vsel %vm282_vm1, %v459_v1, %v274_v24  ;;  %s313_s29 = scalar_lea.sflag [#allocation4], %s919_s1  ;;  %s633_s4 = scalar_lea.vmem %s938_s10, 128 }
  0x7d   : > { %v268_v6 = vmax.f32 %v265_v5, %v461_v4  ;;  %v292_v30 = vsel %vm291_vm2, %v460_v3, %v283_v27  ;;  %p634_p4 = scmp.ne.s32.totalorder %s938_s10, %s633_s4  ;;  %p1012_p0 = scmp.ne.s32.totalorder %s1003_s23, 0 }
  0x7e   : > { %v276_v23 = vstv %s275_s22  ;;  %v285_v26 = vstv %s462_s5  ;;  %v301_v35 = vsel %vm300_vm3, %v461_v4, %v292_v30  ;;  %s730_s15 = smov [#allocation9]  }
  0x7f   : > { %v269_v7 = vsub.f32 %v259_v0, %v268_v6  ;;  %v278_v8 = vsub.f32 %v459_v1, %v268_v6  ;;  %v287_v9 = vsub.f32 %v460_v3, %v268_v6  ;;  %v296_v10 = vsub.f32 %v461_v4, %v268_v6  ;;  %p635_p12 = pnand %p634_p4, %p1012_p0  ;;  %s637_s20 = sshll.u32 %s730_s15, 4  ;;  %s638_s20 = int_to_ptr.vmem [resolvable:$false] %s637_s20 }
  0x80   : > { %v277_v25 = vsel %vm273_vm0, %v276_v23, 0.0  ;;  %v294_v29 = vstv %s463_s18  ;;  %v303_v33 = vstv %s464_s6  ;;  %s639_s7 = scalar_lea.vmem %s638_s20, 256  ;;  %p640_p10 = scmp.lt.s32.totalorder %s938_s10, %s638_s20 }
  0x81   : > { %v270_v11 = vmul.f32 1.442695, %v269_v7  ;;  %v279_v12 = vmul.f32 1.442695, %v278_v8  ;;  %v288_v13 = vmul.f32 1.442695, %v287_v9  ;;  %v286_v28 = vsel %vm282_vm1, %v285_v26, %v277_v25  ;;  %p636_p2 = pneg %p635_p12  ;;  %p641_p11 = scmp.lt.s32.totalorder %s639_s7, %s633_s4 }
  0x82   : > { %v297_v14 = vmul.f32 1.442695, %v296_v10  ;;  %v295_v32 = vsel %vm291_vm2, %v294_v29, %v286_v28 }
  0x83   : > { %550 = vpow2.f32 %v270_v11  ;;  %v304_v37 = vsel %vm300_vm3, %v303_v33, %v295_v32  ;;  %p642_p5 = por %p641_p11, %p640_p10 }
  0x84   : > { %552 = vpow2.f32 %v279_v12 }
  0x85   : > { %554 = vpow2.f32 %v288_v13  ;;  %p643_p3 = pnand %p642_p5, %p636_p2 }
  0x86   : > { %556 = vpow2.f32 %v297_v14 }
  0x8d   : > { %v551_v15 = vpop.eup %550 }
  0x8e   : > { %v553_v16 = vpop.eup %552 }
  0x8f   : > { %v555_v17 = vpop.eup %554  ;;  %v281_v18 = vadd.f32 %v553_v16, %v551_v15 }
  0x90   : > { %v557_v19 = vpop.eup %556 }
  0x91   : > { %v290_v20 = vadd.f32 %v555_v17, %v281_v18 }
  0x93   : > { %v299_v22 = vadd.f32 %v557_v19, %v290_v20 }
  0x95   : > { %558 = vlog2.f32 %v299_v22 }
  0x9f   : > { %v559_v31 = vpop.eup %558 }
  0xa0   : > { %v306_v34 = vmul.f32 0.6931472, %v559_v31 }
  0xa2   : > { %v307_v36 = vadd.f32 %v306_v34, %v268_v6 }
  0xa4   : > { %v308_v38 = vsub.f32 %v307_v36, %v301_v35 }
  0xa6   : > { %v309_v39 = vmul.f32 %v308_v38, %v304_v37 }
  0xa8   : > { %311 = vst [vmem:[%s257_s8] sm:$0xff] %v309_v39 }
  0xa9   : > { %646 = shalt.err (!%p643_p3)
}
  0xaa   : > { %s647_s1 = scalar_lea.hbm %s943_s30, 128  ;;  %s651_s21 = scalar_lea.hbm %s993_s3, 256 }
  0xab   : > { %p648_p7 = scmp.ne.s32.totalorder %s943_s30, %s647_s1  ;;  %p652_p8 = scmp.lt.u32.totalorder %s943_s30, %s993_s3 }
  0xac   : > { %p653_p9 = scmp.lt.u32.totalorder %s651_s21, %s647_s1  ;;  %p655_p4 = scmp.lt.u32.totalorder %s647_s1, %s943_s30 }
  0xad   : > { %p649_p1 = pnand %p648_p7, %p1012_p0 }
  0xae   : > { %p654_p13 = por %p653_p9, %p652_p8 }
  0xaf   : > { %p650_p6 = pneg %p649_p1 }
  0xb0   : > { %p656_p12 = por %p655_p4, %p654_p13 }
  0xb2   : > { %p657_p2 = pnand %p656_p12, %p650_p6 }
  0xb4   : > { %660 = shalt.err (!%p657_p2)
}
  0xb5   : > { %478 = dma.vmem_to_hbm [thread:$0]  (%p1012_p0), %s938_s10, 128, %s943_s30, %s313_s29  }
  0xb6 PF: > { %s339_s5 = sand.u32 1, %s703_s12   ;;  %p1013_p10 = scmp.ne.s32.totalorder %s1004_s24, 0 }
  0xb7   : > { %p1014_p11 = scmp.ge.s32.totalorder %s723_s17, 2  ;;  %s340_s18 = scalar_lea.sflag [#allocation4], %s339_s5 }
  0xb9   : > { %p492_p5 = pnand %p1014_p11, %p1013_p10 }
  0xbb   : > { %698 = dma.done.wait (!%p492_p5), %s340_s18, 128  }
  0xbc   : > { %700 = vsyncadd (!%p492_p5), %s340_s18, 4294967168  ;;  %s23_s17 = sadd.s32 1, %s723_s17   ;;  %s1015_s12 = smov %s707_s13 }
  0xbd   : > { %p20_p3 = scmp.ge.s32.totalorder %s23_s17, 4   ;;  %s1016_s13 = smov %s711_s14 }
  0xbe   : > { %s1017_s14 = smov %s855_s9  ;;  %s1018_s15 = smov %s719_s16 }
  0xbf   : > { %s1019_s16 = smov %s1021_s28  ;;  %22 = sbr.rel (!%p20_p3) target bundleno = 12 (0xc), region = 98 }
  0xc6   :  { %345 = vsyncpa [#allocation3], 1 }
  0xc7   :  { %347 = vsyncpa [#allocation3 + $0x1], 1 }
  0xc8   :  { %348 = vsyncpa [#allocation8], 1 }
  0xc9   :  { %350 = vsyncpa [#allocation8 + $0x1], 1 }
  0xca   :  { %351 = vsyncpa [#allocation4], 1 }
  0xcb   :  { %353 = vsyncpa [#allocation4 + $0x1], 1 }
  0xcc   :  { %354 = vsyncpa [#allocation5], 1 }
  0xcd   :  { %356 = vsyncpa [#allocation5 + $0x1], 1 }

</bundles_post_ra>
